<compile_context>
chip_gen: v6e
topology: v6e:2x2x1
jax: 0.10.0
libtpu: 0.0.40
codegen_flags: <defaults>
</compile_context>

<pallas_src>
import functools
import math

import jax
import jax.numpy as jnp
from jax.experimental import pallas as pl
from jax.experimental.pallas import tpu as pltpu


# ----------------------------------------------------------------------------
# helpers
# ----------------------------------------------------------------------------
@functools.lru_cache(maxsize=1)
def _vmem_budget_bytes():
    """~75% of physical VMEM: ~48 MiB on v7x, ~96 MiB on v5e/v6e."""
    try:
        cap = int(pltpu.get_tpu_info().vmem_capacity_bytes)
        return max(32 * 1024 * 1024, (cap * 3) // 4)
    except Exception:  # conservative fallback, safe on every generation
        return 48 * 1024 * 1024


def _pick_tile(dim, pref, align):
    """Largest tile <= pref that divides `dim` and is a multiple of `align`;
    falls back to the full dim (always legal: block == full array dim)."""
    if dim <= pref:
        return dim
    t = (pref // align) * align
    while t >= align:
        if dim % t == 0:
            return t
        t -= align
    return dim


def _choose_tq(Sq, Sk, GL, grp, has_mask, budget, p_bytes):
    """Pick the largest query tile whose per-step working set fits `budget`."""

    def est(tq):
        b = 0
        b += 2 * tq * GL * 2                 # q block, bf16, double-buffered
        b += 2 * Sk * GL * 2 * 2             # k + v blocks
        if has_mask:
            b += 2 * tq * Sk * 2             # additive bf16 mask
        b += 2 * tq * GL * 2                 # o block
        if p_bytes:
            b += 2 * grp * tq * Sk * p_bytes  # p_attn block
        b += 3 * tq * Sk * 4                 # live scores / exp / p (f32)
        b += tq * GL * 4                     # o scratch
        return b

    if Sq <= 8:
        return Sq
    cands = [t for t in range(8, min(Sq, 512) + 1, 8) if Sq % t == 0]
    if not cands:
        return Sq
    best = cands[0]
    for t in cands:
        if est(t) <= budget:
            best = t
    return best


# ----------------------------------------------------------------------------
# Kernel 1: tiled Linear  y = x @ W_t + b   (W passed pre-transposed, bf16)
# ----------------------------------------------------------------------------
def _linear_kernel(x_ref, w_ref, b_ref, o_ref, acc_ref):
    k = pl.program_id(2)

    @pl.when(k == 0)
    def _():
        acc_ref[...] = jnp.zeros_like(acc_ref)

    acc_ref[...] += jnp.dot(
        x_ref[...].astype(jnp.bfloat16),
        w_ref[...].astype(jnp.bfloat16),
        preferred_element_type=jnp.float32,
    )

    @pl.when(k == pl.num_programs(2) - 1)
    def _():
        o_ref[...] = (acc_ref[...] + b_ref[...].astype(jnp.float32)).astype(
            o_ref.dtype
        )


def pallas_linear(x2d, w_t, b, out_dtype=jnp.float32, tm=512, tn=512, tk=1024):
    """x2d: (M, K) bf16/f32, w_t: (K, N) bf16, b: (N,) f32  ->  (M, N)."""
    M, K = x2d.shape
    K2, N = w_t.shape
    assert K == K2
    TM = _pick_tile(M, tm, 8)
    TN = _pick_tile(N, tn, 128)
    TK = _pick_tile(K, tk, 128)
    grid = (M // TM, N // TN, K // TK)
    b2d = b.reshape(1, N).astype(jnp.float32)
    budget = _vmem_budget_bytes()

    cost = pl.CostEstimate(
        flops=2 * M * N * K,
        transcendentals=0,
        bytes_accessed=(M * K * x2d.dtype.itemsize + K * N * 2 + N * 4
                        + M * N * jnp.dtype(out_dtype).itemsize),
    )

    return pl.pallas_call(
        _linear_kernel,
        out_shape=jax.ShapeDtypeStruct((M, N), out_dtype),
        grid=grid,
        in_specs=[
            pl.BlockSpec((TM, TK), lambda i, j, k: (i, k)),
            pl.BlockSpec((TK, TN), lambda i, j, k: (k, j)),
            pl.BlockSpec((1, TN), lambda i, j, k: (0, j)),
        ],
        out_specs=pl.BlockSpec((TM, TN), lambda i, j, k: (i, j)),
        scratch_shapes=[pltpu.VMEM((TM, TN), jnp.float32)],
        compiler_params=pltpu.CompilerParams(
            dimension_semantics=("parallel", "parallel", "arbitrary"),
            vmem_limit_bytes=budget,
        ),
        cost_estimate=cost,
    )(x2d, w_t, b2d)


# ----------------------------------------------------------------------------
# Kernel 2: multi-head scaled dot-product attention, head-group tiled.
#   One grid step = one batch, one 128-lane head group, one TQ query tile.
#   1/sqrt(d_k) already folded into the Q projection.
# ----------------------------------------------------------------------------
def _attn_kernel(*refs, heads_per_grp, d_k, has_mask, return_attn):
    idx = 0
    q_ref = refs[idx]; idx += 1
    k_ref = refs[idx]; idx += 1
    v_ref = refs[idx]; idx += 1
    m_ref = None
    if has_mask:
        m_ref = refs[idx]; idx += 1
    o_ref = refs[idx]; idx += 1
    p_ref = None
    if return_attn:
        p_ref = refs[idx]; idx += 1
    o_acc = refs[idx]                       # (TQ, GL) f32 VMEM scratch

    q = q_ref[0].astype(jnp.bfloat16)       # (TQ, GL)
    k = k_ref[0].astype(jnp.bfloat16)       # (Sk, GL)
    v = v_ref[0].astype(jnp.bfloat16)       # (Sk, GL)

    add_mask = None
    if m_ref is not None:
        add_mask = m_ref[0].astype(jnp.float32)   # (TQ, Sk) additive 0/-1e9

    for hh in range(heads_per_grp):
        sl = slice(hh * d_k, (hh + 1) * d_k)
        # scores = q_h @ k_h^T (contraction on d_k, no explicit transpose)
        s = jax.lax.dot_general(
            q[:, sl], k[:, sl], (((1,), (1,)), ((), ())),
            preferred_element_type=jnp.float32,
        )  # (TQ, Sk) f32
        if add_mask is not None:
            s = s + add_mask
        m_row = jnp.max(s, axis=-1, keepdims=True)
        e = jnp.exp(s - m_row)
        # exact softmax (p_attn is user-visible -> no approx reciprocal)
        p = e / jnp.sum(e, axis=-1, keepdims=True)
        if p_ref is not None:
            p_ref[0, hh] = p.astype(p_ref.dtype)
        # write each head's PV result into its lane slice of the scratch
        o_acc[:, sl] = jnp.dot(p.astype(jnp.bfloat16), v[:, sl],
                               preferred_element_type=jnp.float32)
    # single lane-dense store of the (TQ, GL) group output
    o_ref[0] = o_acc[...].astype(o_ref.dtype)


def pallas_attention(q, k, v, num_heads, d_model, add_mask=None,
                     q_lane_start=0, k_lane_start=0, v_lane_start=0,
                     attn_dtype=jnp.float32, return_attn=True,
                     out_dtype=jnp.bfloat16):
    """q: (B, Sq, *), k/v: (B, Sk, *).  The *_lane_start args give the element
    offset of the actual q/k/v inside packed (fused-QKV / fused-KV) tensors so
    the kernel reads straight out of them via the BlockSpec index_map.

    Returns (out (B, Sq, D), p_attn (B, H, Sq, Sk) or None)."""
    B, Sq = q.shape[0], q.shape[1]
    Sk = k.shape[1]
    D = d_model
    d_k = D // num_heads

    # Pack heads into 128-lane groups (lane-aligned slices, better MXU fill).
    if d_k >= 128:
        grp = 1
    else:
        grp = max(1, min(num_heads, 128 // d_k))
        while num_heads % grp != 0:
            grp -= 1
    GL = grp * d_k                    # lanes per head group
    HG = num_heads // grp             # number of head groups (grid axis)
    assert q_lane_start % GL == 0 and k_lane_start % GL == 0 and v_lane_start % GL == 0
    q_off, k_off, v_off = q_lane_start // GL, k_lane_start // GL, v_lane_start // GL

    budget = _vmem_budget_bytes()
    has_mask = add_mask is not None
    p_bytes = jnp.dtype(attn_dtype).itemsize if return_attn else 0
    TQ = _choose_tq(Sq, Sk, GL, grp, has_mask, int(budget * 0.6), p_bytes)

    q_spec = pl.BlockSpec((1, TQ, GL), lambda b, hg, qi: (b, qi, q_off + hg))
    k_spec = pl.BlockSpec((1, Sk, GL), lambda b, hg, qi: (b, 0, k_off + hg))
    v_spec = pl.BlockSpec((1, Sk, GL), lambda b, hg, qi: (b, 0, v_off + hg))
    o_spec = pl.BlockSpec((1, TQ, GL), lambda b, hg, qi: (b, qi, hg))

    in_specs = [q_spec, k_spec, v_spec]
    inputs = [q, k, v]
    if has_mask:
        mb = add_mask.shape[0]        # 1 or B; batch handled in the index_map
        in_specs.append(
            pl.BlockSpec((1, TQ, Sk),
                         lambda b, hg, qi: (b if mb > 1 else 0, qi, 0)))
        inputs.append(add_mask)

    out_shapes = [jax.ShapeDtypeStruct((B, Sq, D), out_dtype)]
    out_specs = [o_spec]
    if return_attn:
        out_shapes.append(jax.ShapeDtypeStruct((B, num_heads, Sq, Sk), attn_dtype))
        out_specs.append(
            pl.BlockSpec((1, grp, TQ, Sk), lambda b, hg, qi: (b, hg, qi, 0)))

    kernel = functools.partial(_attn_kernel, heads_per_grp=grp, d_k=d_k,
                               has_mask=has_mask, return_attn=return_attn)

    bytes_accessed = (B * Sq * D + 2 * B * Sk * D + B * Sq * D) * 2
    if has_mask:
        bytes_accessed += int(add_mask.size) * 2
    if return_attn:
        bytes_accessed += B * num_heads * Sq * Sk * p_bytes
    cost = pl.CostEstimate(
        flops=4 * B * num_heads * Sq * Sk * d_k,
        transcendentals=B * num_heads * Sq * Sk,
        bytes_accessed=bytes_accessed,
    )

    outs = pl.pallas_call(
        kernel,
        out_shape=tuple(out_shapes) if return_attn else out_shapes[0],
        grid=(B, HG, Sq // TQ),
        in_specs=in_specs,
        out_specs=tuple(out_specs) if return_attn else out_specs[0],
        scratch_shapes=[pltpu.VMEM((TQ, GL), jnp.float32)],
        compiler_params=pltpu.CompilerParams(
            dimension_semantics=("parallel", "parallel", "parallel"),
            vmem_limit_bytes=budget,
        ),
        cost_estimate=cost,
    )(*inputs)
    if return_attn:
        return outs
    return outs, None


# ----------------------------------------------------------------------------
# MultiHeadedAttention forward (eval mode: dropout is identity)
# ----------------------------------------------------------------------------
class MultiHeadedAttentionPallas:
    def __init__(self, h, d_model, key, dropout=0.1):
        assert d_model % h == 0
        self.h = h
        self.d_k = d_model // h
        self.d_model = d_model
        self.dropout_p = dropout  # TODO(synk): dropout not applied (eval mode)

        # 4 Linear(d_model, d_model) layers, PyTorch-style uniform init.
        bound = 1.0 / math.sqrt(d_model)
        keys = jax.random.split(key, 8)
        w_f32, b_f32 = [], []
        for i in range(4):
            w = jax.random.uniform(keys[2 * i], (d_model, d_model), jnp.float32,
                                   -bound, bound)  # PyTorch layout (out, in)
            b = jax.random.uniform(keys[2 * i + 1], (d_model,), jnp.float32,
                                   -bound, bound)
            w_f32.append(w)
            b_f32.append(b)
        self._w_f32, self._b_f32 = w_f32, b_f32    # f32 copies for reference

        scale = 1.0 / math.sqrt(self.d_k)
        # Pre-transposed (in, out), bf16 for the MXU; fold 1/sqrt(d_k) into Q.
        wq_t = (w_f32[0].T * scale).astype(jnp.bfloat16)
        wk_t = w_f32[1].T.astype(jnp.bfloat16)
        wv_t = w_f32[2].T.astype(jnp.bfloat16)
        self.w_q, self.w_k, self.w_v = wq_t, wk_t, wv_t
        self.b_q = b_f32[0] * scale
        self.b_k, self.b_v = b_f32[1], b_f32[2]
        # Fused QKV (self-attention) and KV (cross-attention) weights.
        self.w_qkv = jnp.concatenate([wq_t, wk_t, wv_t], axis=1)      # (D, 3D)
        self.b_qkv = jnp.concatenate([self.b_q, self.b_k, self.b_v])  # (3D,)
        self.w_kv = jnp.concatenate([wk_t, wv_t], axis=1)             # (D, 2D)
        self.b_kv = jnp.concatenate([self.b_k, self.b_v])             # (2D,)
        self.w_o = w_f32[3].T.astype(jnp.bfloat16)
        self.b_o = b_f32[3]

    def __call__(self, query, key, value, mask=None, need_weights=True):
        B, Sq, D = query.shape
        Sk = key.shape[1]
        assert D == self.d_model

        add_mask = None
        if mask is not None:
            m = mask
            if m.ndim == 2:
                m = m[None]
            mb = m.shape[0]
            m = jnp.broadcast_to(m, (mb, Sq, Sk))
            # Additive bf16 mask (0 keep / -1e9 drop); batch is NOT broadcast.
            add_mask = jnp.where(m == 0, -1e9, 0.0).astype(jnp.bfloat16)

        # bf16 activations at the boundary (halves activation DMA in the GEMMs)
        q_in = query.astype(jnp.bfloat16)

        if (query is key) and (key is value):
            # Fused QKV projection: one GEMM, activation read from HBM once.
            qkv = pallas_linear(q_in.reshape(B * Sq, D), self.w_qkv, self.b_qkv,
                                out_dtype=jnp.bfloat16).reshape(B, Sq, 3 * D)
            x, p_attn = pallas_attention(
                qkv, qkv, qkv, self.h, D, add_mask=add_mask,
                q_lane_start=0, k_lane_start=D, v_lane_start=2 * D,
                return_attn=need_weights)
        elif key is value:
            # Cross-attention with shared K/V activation: fused (D, 2D) GEMM.
            k_in = key.astype(jnp.bfloat16)
            q = pallas_linear(q_in.reshape(B * Sq, D), self.w_q, self.b_q,
                              out_dtype=jnp.bfloat16).reshape(B, Sq, D)
            kv = pallas_linear(k_in.reshape(B * Sk, D), self.w_kv, self.b_kv,
                               out_dtype=jnp.bfloat16).reshape(B, Sk, 2 * D)
            x, p_attn = pallas_attention(
                q, kv, kv, self.h, D, add_mask=add_mask,
                k_lane_start=0, v_lane_start=D, return_attn=need_weights)
        else:
            k_in = key.astype(jnp.bfloat16)
            v_in = value.astype(jnp.bfloat16)
            q = pallas_linear(q_in.reshape(B * Sq, D), self.w_q, self.b_q,
                              out_dtype=jnp.bfloat16).reshape(B, Sq, D)
            k = pallas_linear(k_in.reshape(B * Sk, D), self.w_k, self.b_k,
                              out_dtype=jnp.bfloat16).reshape(B, Sk, D)
            v = pallas_linear(v_in.reshape(B * Sk, D), self.w_v, self.b_v,
                              out_dtype=jnp.bfloat16).reshape(B, Sk, D)
            x, p_attn = pallas_attention(q, k, v, self.h, D, add_mask=add_mask,
                                         return_attn=need_weights)

        # x is already (B, Sq, h*d_k) lane-dense bf16 -> feed the output Linear.
        out = pallas_linear(x.reshape(B * Sq, D), self.w_o, self.b_o,
                            out_dtype=jnp.float32).reshape(B, Sq, D)
        return out, p_attn


# ----------------------------------------------------------------------------
# pure-JAX f32 reference (mirrors the PyTorch module) for a loose check
# ----------------------------------------------------------------------------
def _reference_mha(mha, query, key, value, mask=None):
    h, d_k = mha.h, mha.d_k
    B, Sq, D = query.shape
    Sk = key.shape[1]

    def lin(x, i):
        return x @ mha._w_f32[i].T + mha._b_f32[i]

    q = lin(query, 0).reshape(B, Sq, h, d_k).transpose(0, 2, 1, 3)
    k = lin(key, 1).reshape(B, Sk, h, d_k).transpose(0, 2, 1, 3)
    v = lin(value, 2).reshape(B, Sk, h, d_k).transpose(0, 2, 1, 3)
    scores = jnp.einsum("bhqd,bhkd->bhqk", q, k) / math.sqrt(d_k)
    if mask is not None:
        scores = jnp.where(mask[:, None] == 0, -1e9, scores)
    p = jax.nn.softmax(scores, axis=-1)
    x = jnp.einsum("bhqk,bhkd->bhqd", p, v)
    x = x.transpose(0, 2, 1, 3).reshape(B, Sq, D)
    return lin(x, 3), p


if __name__ == "__main__":
    # Small shapes consistent with the module: batch=2, seq=8, d_model=32, h=4.
    B, S, D, H = 2, 8, 32, 4
    root = jax.random.PRNGKey(0)
    k_params, k_x, k_kv = jax.random.split(root, 3)

    mha = MultiHeadedAttentionPallas(H, D, k_params)
    x = jax.random.normal(k_x, (B, S, D), jnp.float32)

    # --- self-attention (fused-QKV fast path), no mask ---
    out, attn = mha(x, x, x, mask=None)
    out = jax.block_until_ready(out)
    attn = jax.block_until_ready(attn)
    assert out.shape == (B, S, D)
    assert attn.shape == (B, H, S, S)
    assert bool(jnp.allclose(jnp.sum(attn, axis=-1), 1.0, atol=1e-2))

    ref_out, ref_attn = _reference_mha(mha, x, x, x, mask=None)
    assert bool(jnp.allclose(out, ref_out, atol=1e-1))      # bf16 matmuls
    assert bool(jnp.allclose(attn, ref_attn, atol=5e-2))

    # --- causal mask on the self-attention path ---
    causal = (jnp.arange(S)[:, None] >= jnp.arange(S)[None, :]).astype(jnp.int32)
    mask = jnp.broadcast_to(causal, (B, S, S))
    out_m, attn_m = mha(x, x, x, mask=mask)
    jax.block_until_ready(out_m)
    assert bool(jnp.allclose(jnp.sum(attn_m, axis=-1), 1.0, atol=1e-2))
    masked_prob = jnp.max(jnp.where(mask[:, None] == 0, attn_m, 0.0))
    assert float(masked_prob) < 1e-6

    # --- cross-attention (fused-KV path), Sq != Sk ---
    kv = jax.random.normal(k_kv, (B, 2 * S, D), jnp.float32)
    out_c, attn_c = mha(x, kv, kv, mask=None)
    jax.block_until_ready(out_c)
    assert out_c.shape == (B, S, D)
    assert attn_c.shape == (B, H, S, 2 * S)
    assert bool(jnp.allclose(jnp.sum(attn_c, axis=-1), 1.0, atol=1e-2))

    print("KERNEL_OK")
</pallas_src>

<mosaic_0001>
module attributes {stable_mosaic.version = 11 : i64} {
  func.func @_linear_kernel(%arg0: i32, %arg1: i32, %arg2: i32, %arg3: memref<16x32xbf16, #tpu.memory_space<vmem>>, %arg4: memref<32x96xbf16, #tpu.memory_space<vmem>>, %arg5: memref<1x96xf32, #tpu.memory_space<vmem>>, %arg6: memref<16x96xbf16, #tpu.memory_space<vmem>>, %arg7: memref<16x96xf32, #tpu.memory_space<vmem>>) attributes {dimension_semantics = [#tpu.dimension_semantics<parallel>, #tpu.dimension_semantics<parallel>, #tpu.dimension_semantics<arbitrary>], iteration_bounds = array<i64: 1, 1, 1>, scalar_prefetch = 0 : i64, scratch_operands = 1 : i64, tpu.core_type = #tpu.core_type<tc>, window_params = [{transform_indices = @transform_0, window_bounds = array<i64: 16, 32>}, {transform_indices = @transform_1, window_bounds = array<i64: 32, 96>}, {transform_indices = @transform_2, window_bounds = array<i64: 1, 96>}, {transform_indices = @transform_3, window_bounds = array<i64: 16, 96>}]} {
    %c0_i32 = arith.constant 0 : i32
    %0 = arith.cmpi eq, %arg2, %c0_i32 : i32
    %1 = arith.extui %0 : i1 to i32
    %c0_i32_0 = arith.constant 0 : i32
    %2 = arith.cmpi ne, %1, %c0_i32_0 : i32
    scf.if %2 {
      %cst_10 = arith.constant 0.000000e+00 : f32
      %12 = vector.broadcast %cst_10 : f32 to vector<16x96xf32>
      %c0_11 = arith.constant 0 : index
      %c0_12 = arith.constant 0 : index
      %13 = vector.load %arg7[%c0_11, %c0_12] : memref<16x96xf32, #tpu.memory_space<vmem>>, vector<16x96xf32>
      tpu.vector_store %arg7[%c0_11, %c0_12], %12 {strides = array<i32>} : memref<16x96xf32, #tpu.memory_space<vmem>>, vector<16x96xf32>,
    } else {
    }
    %c0 = arith.constant 0 : index
    %c0_1 = arith.constant 0 : index
    %3 = vector.load %arg7[%c0, %c0_1] : memref<16x96xf32, #tpu.memory_space<vmem>>, vector<16x96xf32>
    %c0_2 = arith.constant 0 : index
    %c0_3 = arith.constant 0 : index
    %4 = vector.load %arg3[%c0_2, %c0_3] : memref<16x32xbf16, #tpu.memory_space<vmem>>, vector<16x32xbf16>
    %c0_4 = arith.constant 0 : index
    %c0_5 = arith.constant 0 : index
    %5 = vector.load %arg4[%c0_4, %c0_5] : memref<32x96xbf16, #tpu.memory_space<vmem>>, vector<32x96xbf16>
    %cst = arith.constant dense<0.000000e+00> : vector<16x96xf32>
    %6 = tpu.matmul %4, %5, %cst {dimension_numbers = #tpu.dot_dimension_numbers<[1], [0], [0], [1], [0, 0, 1, 1], [], []>} : vector<16x32xbf16>, vector<32x96xbf16>, vector<16x96xf32> -> vector<16x96xf32>
    %7 = arith.addf %3, %6 : vector<16x96xf32>
    %c0_6 = arith.constant 0 : index
    %c0_7 = arith.constant 0 : index
    %8 = vector.load %arg7[%c0_6, %c0_7] : memref<16x96xf32, #tpu.memory_space<vmem>>, vector<16x96xf32>
    tpu.vector_store %arg7[%c0_6, %c0_7], %7 {strides = array<i32>} : memref<16x96xf32, #tpu.memory_space<vmem>>, vector<16x96xf32>,
    %c0_i32_8 = arith.constant 0 : i32
    %9 = arith.cmpi eq, %arg2, %c0_i32_8 : i32
    %10 = arith.extui %9 : i1 to i32
    %c0_i32_9 = arith.constant 0 : i32
    %11 = arith.cmpi ne, %10, %c0_i32_9 : i32
    scf.if %11 {
      %c0_10 = arith.constant 0 : index
      %c0_11 = arith.constant 0 : index
      %12 = vector.load %arg7[%c0_10, %c0_11] : memref<16x96xf32, #tpu.memory_space<vmem>>, vector<16x96xf32>
      %c0_12 = arith.constant 0 : index
      %c0_13 = arith.constant 0 : index
      %13 = vector.load %arg5[%c0_12, %c0_13] : memref<1x96xf32, #tpu.memory_space<vmem>>, vector<1x96xf32>
      %14 = vector.broadcast %13 : vector<1x96xf32> to vector<16x96xf32>
      %15 = arith.addf %12, %14 : vector<16x96xf32>
      %16 = arith.truncf %15 : vector<16x96xf32> to vector<16x96xbf16>
      %c0_14 = arith.constant 0 : index
      %c0_15 = arith.constant 0 : index
      %17 = vector.load %arg6[%c0_14, %c0_15] : memref<16x96xbf16, #tpu.memory_space<vmem>>, vector<16x96xbf16>
      tpu.vector_store %arg6[%c0_14, %c0_15], %16 {strides = array<i32>} : memref<16x96xbf16, #tpu.memory_space<vmem>>, vector<16x96xbf16>,
    } else {
    }
    return
  }
  func.func @transform_0(%arg0: i32, %arg1: i32, %arg2: i32) -> (i32, i32) {
    %c0_i32 = arith.constant 0 : i32
    return %arg0, %arg2 : i32, i32
  }
  func.func @transform_1(%arg0: i32, %arg1: i32, %arg2: i32) -> (i32, i32) {
    %c0_i32 = arith.constant 0 : i32
    return %arg2, %arg1 : i32, i32
  }
  func.func @transform_2(%arg0: i32, %arg1: i32, %arg2: i32) -> (i32, i32) {
    %c0_i32 = arith.constant 0 : i32
    %c0_i32_0 = arith.constant 0 : i32
    return %c0_i32, %arg1 : i32, i32
  }
  func.func @transform_3(%arg0: i32, %arg1: i32, %arg2: i32) -> (i32, i32) {
    %c0_i32 = arith.constant 0 : i32
    return %arg0, %arg1 : i32, i32
  }
}

</mosaic_0001>

<bundles_post_ra>
// kernel: tpu_custom_call.1
= control target key start
LH: loop header
LB: loop body
LE: loop exit
PB: predicated region body
PF: predicated region fallthrough
CT: control target
= control target key end

     0   :  { %8 = vsyncpa [#allocation4], 0  ;;  %s317_s0 = inlined_call_operand.hbm [shape: bf16[16,32], index: 0, kind: input, shape index: {}]   ;;  %s318_s1 = inlined_call_operand.hbm [shape: bf16[32,96], index: 1, kind: input, shape index: {}]   ;;  %s319_s2 = inlined_call_operand.vmem [shape: f32[1,96], index: 2, kind: input, shape index: {}]   ;;  %s320_s3 = inlined_call_operand.hbm [shape: bf16[16,96], index: 3, kind: output, shape index: {}]  }
   0x1   :  { %9 = vsyncpa [#allocation7], 0 }
   0x2   :  { %10 = vsyncpa [#allocation5], 0  ;;  %s265_s12 = smov [#allocation3]  }
   0x3   :  { %s16_s13 = sshll.u32 %s265_s12, 4  ;;  %s17_s13 = int_to_ptr.vmem [resolvable:$true] %s16_s13 }
   0x4   :  { %s207_s14 = scalar_lea.vmem %s17_s13, 128  ;;  %p212_p1 = scmp.lt.s32.totalorder %s17_s13, %s17_s13 }
   0x5   :  { %p208_p0 = scmp.ne.s32.totalorder %s17_s13, %s207_s14  ;;  %p213_p2 = scmp.lt.s32.totalorder %s207_s14, %s207_s14 }
   0x7   :  { %p214_p3 = por %p213_p2, %p212_p1 }
   0x9   :  { %p215_p4 = pnand %p214_p3, %p208_p0 }
   0xb   :  { %218 = shalt.err (!%p215_p4)
}
   0xc   :  { %s266_s15 = smov 64   ;;  %s267_s16 = smov 4  }
   0xd   :  { %22 = dma.hbm_to_vmem [thread:$0]  %s317_s0, 128, %s17_s13, [#allocation4], %s266_s15, %s266_s15, %s267_s16  }
   0xe   :  { %s268_s19 = smov [#allocation6]  }
   0xf   :  { %s28_s20 = sshll.u32 %s268_s19, 4  ;;  %s29_s20 = int_to_ptr.vmem [resolvable:$true] %s28_s20 }
  0x10   :  { %s227_s21 = scalar_lea.vmem %s29_s20, 256  ;;  %p232_p6 = scmp.lt.s32.totalorder %s29_s20, %s29_s20 }
  0x11   :  { %p228_p5 = scmp.ne.s32.totalorder %s29_s20, %s227_s21  ;;  %p233_p7 = scmp.lt.s32.totalorder %s227_s21, %s227_s21 }
  0x13   :  { %p234_p8 = por %p233_p7, %p232_p6 }
  0x15   :  { %p235_p9 = pnand %p234_p8, %p228_p5 }
  0x17   :  { %238 = shalt.err (!%p235_p9)
}
  0x18   :  { %34 = dma.hbm_to_vmem [thread:$0]  %s318_s1, 256, %s29_s20, [#allocation7], %s266_s15, %s266_s15, %s267_s16  }
  0x19   :  { %259 = dma.done.wait [#allocation4], 128  }
  0x1a   :  { %260 = vsyncadd [#allocation4], 4294967168 }
  0x1b   :  { %261 = dma.done.wait [#allocation7], 256  }
  0x1c   :  { %262 = vsyncadd [#allocation7], 4294967040  ;;  %vm48_vm0 = vcmask 785408   ;;  %v269_v0 = vmov 0.0   ;;  %vm270_vm1 = vmmov 0   ;;  %v196_v1 = vld [vmem:[#allocation6 + $0x8] sm:$0xff]  }
  0x1d   :  { %49 = vst.msk [vmem:[#allocation2] sm:$0xff] %vm48_vm0, %v269_v0  ;;  %50 = vst.msk [vmem:[#allocation2 + $0x8] sm:$0xff] %vm48_vm0, %v269_v0  ;;  %181 = vmatprep.subr.bf16.mxu0 %v269_v0  ;;  %185 = vmatprep.mubr.msk.bf16.mxu0 %vm270_vm1, %v269_v0  ;;  %v197_v2 = vld [vmem:[#allocation6] sm:$0xff]   ;;  %v198_v3 = vld [vmem:[#allocation3] sm:$0xff]   ;;  %vm76_vm2 = vcmask 261120   ;;  %vm148_vm3 = vcmask 781312  }
  0x1e   :  { %182 = vmatpush3.bf16.msra.mxu0 %v196_v1  ;;  %v173_v12 = vld [vmem:[%s319_s2] ss:$0 sm:$0xff]  ;;  %s271_s24 = smov [#allocation8]  }
  0x1f   :  { %183 = vmatprep.subr.bf16.mxu0 %v269_v0  ;;  %s156_s25 = sshll.u32 %s271_s24, 4  ;;  %s157_s25 = int_to_ptr.vmem [resolvable:$true] %s156_s25 }
  0x20   :  { %s239_s26 = scalar_lea.vmem %s157_s25, 128  ;;  %p244_p11 = scmp.lt.s32.totalorder %s157_s25, %s157_s25 }
  0x21   :  { %p240_p10 = scmp.ne.s32.totalorder %s157_s25, %s239_s26  ;;  %p245_p12 = scmp.lt.s32.totalorder %s239_s26, %s239_s26 }
  0x22   :  { %184 = vmatpush3.bf16.msra.mxu0 %v197_v2 }
  0x23   :  { %p246_p13 = por %p245_p12, %p244_p11 }
  0x24   :  { %v51_v4 = vld [vmem:[#allocation2] sm:$0xff]  ;;  %v52_v8 = vld [vmem:[#allocation2 + $0x8] sm:$0xff] }
  0x25   :  { %186 = vmatmul.mubr.msk.bf16.vlgmr.msra.gmra.mxu0 %vm76_vm2, %v198_v3  ;;  %p247_p0 = pnand %p246_p13, %p240_p10 }
  0xe5   :  { %v114_v5 = vpop.f32.mrf.mxu0 }
  0xe6   :  { %v121_v6 = vadd.f32 %v114_v5, %v51_v4 }
  0xe7   :  { %v187_v7 = vpop.f32.mrf.mxu0 }
  0xe8   :  { %124 = vst.msk [vmem:[#allocation2] sm:$0xff] %vm48_vm0, %v121_v6 }
  0xe9   :  { %v117_v9 = vpop.f32.mrf.mxu0 }
  0xea   :  { %v122_v10 = vadd.f32 %v117_v9, %v52_v8 }
  0xeb   :  { %v188_v11 = vpop.f32.mrf.mxu0 }
  0xec   :  { %125 = vst.msk [vmem:[#allocation2 + $0x8] sm:$0xff] %vm48_vm0, %v122_v10 }
  0xef   :  { %v129_v13 = vld [vmem:[#allocation2] sm:$0xff] }
  0xf0   :  { %v138_v14 = vadd.f32 %v173_v12, %v129_v13 }
  0xf2   :  { %v176_v15 = vpack.c.bf16 %v138_v14, %v138_v14 }
  0xf3   :  { %v130_v16 = vld [vmem:[#allocation2 + $0x8] sm:$0xff] }
  0xf4   :  { %v139_v17 = vadd.f32 %v173_v12, %v130_v16  ;;  %149 = vst.msk [vmem:[#allocation8] sm:$0xf] %vm148_vm3, %v176_v15 }
  0xf6   :  { %v177_v18 = vpack.c.bf16 %v139_v17, %v139_v17 }
  0xf8   :  { %150 = vst.msk [vmem:[#allocation8 + $0x4] sm:$0xf] %vm148_vm3, %v177_v18 }
  0xf9   :  { %250 = shalt.err (!%p247_p0)
}
  0xfa   :  { %162 = dma.vmem_to_hbm [thread:$0]  %s157_s25, 128, %s320_s3, [#allocation5], %s266_s15, %s266_s15, %s267_s16  }
  0xfb   :  { %263 = dma.done.wait [#allocation5], 128  }
  0xfc   :  { %264 = vsyncadd [#allocation5], 4294967168 }
  0xfd   :  { %166 = vsyncpa [#allocation4], 1 }
  0xfe   :  { %167 = vsyncpa [#allocation7], 1 }
  0xff   :  { %168 = vsyncpa [#allocation5], 1 }

</bundles_post_ra>
